<compile_context>
chip_gen: v6e
topology: v6e:2x2x1
jax: 0.10.0
libtpu: 0.0.40
codegen_flags: <defaults>
</compile_context>

<pallas_src>
import functools

import jax
import jax.numpy as jnp
from jax.experimental import pallas as pl
from jax.experimental.pallas import tpu as pltpu


def _rmsnorm_kernel(x_ref, w_ref, o_ref, *, eps: float):
    x = x_ref[...]                                            # (tm, D), input dtype
    xf = x.astype(jnp.float32)
    # Reduction always in float32 (bf16-safe mean of squares).
    ms = jnp.mean(xf * xf, axis=-1, keepdims=True)            # (tm, 1) f32
    denom = jnp.sqrt(ms) + jnp.float32(eps)                   # eps AFTER sqrt (matches module)
    # NOTE: with eps == 0, masked/garbage tail rows of a partial block can hit
    # 0/0 -> NaN; harmless here because those rows' stores are masked off.
    if x.dtype == jnp.float32:
        inv = pl.reciprocal(denom, approx=False)              # exact: keep 1e-5 tolerance
        o_ref[...] = ((xf * inv) * w_ref[...]).astype(o_ref.dtype)
    else:
        # bf16/fp8: EUP approx reciprocal + full-tile multiplies in input dtype
        # (native on v6e/v7x; v5e promotes internally — still correct).
        inv = pl.reciprocal(denom, approx=True).astype(x.dtype)
        o_ref[...] = ((x * inv) * w_ref[...]).astype(o_ref.dtype)


def _choose_row_tile(rows: int, D: int, itemsize: int, row_align: int,
                     *, target_bytes: int = 4 << 20, min_steps: int = 4,
                     min_block_bytes: int = 512 << 10) -> int:
    """Pick a row tile so the x block is ~4 MiB, without starving the grid."""
    bytes_per_row = max(D * itemsize, 1)
    rt = max(row_align, (target_bytes // bytes_per_row) // row_align * row_align)
    rows_up = -(-rows // row_align) * row_align
    rt = min(rt, rows_up)

    # Keep >= min_steps grid steps when the problem is big enough to benefit
    # (megacore sharding / pipelining), but never shrink below a useful block.
    while (rt > row_align
           and -(-rows // rt) < min_steps
           and (rt // 2) * bytes_per_row >= min_block_bytes):
        rt = max(row_align, (rt // 2) // row_align * row_align)

    # Prefer an even step count (v7x: 2 TensorCores shard the parallel axis).
    steps = -(-rows // rt)
    if steps > 1 and steps % 2 == 1:
        alt = -(-rows // (steps + 1))
        alt = max(row_align, -(-alt // row_align) * row_align)
        alt = min(alt, rt)
        if -(-rows // alt) % 2 == 0:
            rt = alt
    return rt


def rmsnorm(x: jax.Array, weight: jax.Array, eps: float = 1e-6,
            *, row_tile: int | None = None) -> jax.Array:
    """RMSNorm over the last axis of x. weight has shape (emb_dim,)."""
    orig_shape = x.shape
    D = orig_shape[-1]
    assert weight.shape == (D,)

    x2d = x.reshape(-1, D)
    rows = x2d.shape[0]

    itemsize = jnp.dtype(x.dtype).itemsize
    # Sublane packing: f32 -> 8, bf16 -> 16, int8/fp8 -> 32.
    row_align = max(8, 32 // itemsize)

    if row_tile is None:
        row_tile = _choose_row_tile(rows, D, itemsize, row_align)
    row_tile = max(row_align, (row_tile // row_align) * row_align)

    # No host-side padding: the grid over-covers rows and Pallas masks the
    # partial trailing block's stores.
    grid_steps = pl.cdiv(rows, row_tile)

    # Weight: one (1, D) resident block, pre-cast to the kernel compute dtype
    # so there's no per-step cast inside the kernel.
    w2d = weight.reshape(1, D).astype(x.dtype)

    # Live VMEM: double-buffered x + out blocks, plus (for narrow dtypes) the
    # f32 intermediate used by the reduction.  Cap well inside v7x's 64 MiB.
    block_bytes = row_tile * D * itemsize
    f32_extra = 0 if itemsize == 4 else row_tile * D * 4
    vmem_budget = 4 * block_bytes + 2 * f32_extra + D * 4 + (8 << 20)
    vmem_budget = int(min(48 << 20, max(16 << 20, vmem_budget)))

    out2d = pl.pallas_call(
        functools.partial(_rmsnorm_kernel, eps=eps),
        out_shape=jax.ShapeDtypeStruct((rows, D), x.dtype),
        grid_spec=pltpu.PrefetchScalarGridSpec(
            num_scalar_prefetch=0,
            grid=(grid_steps,),
            in_specs=[
                pl.BlockSpec((row_tile, D), lambda i: (i, 0)),  # x rows (streamed)
                pl.BlockSpec((1, D), lambda i: (0, 0)),         # weight (resident)
            ],
            out_specs=pl.BlockSpec((row_tile, D), lambda i: (i, 0)),
        ),
        compiler_params=pltpu.CompilerParams(
            dimension_semantics=("parallel",),
            vmem_limit_bytes=vmem_budget,
        ),
    )(x2d, w2d)

    return out2d.reshape(orig_shape)


def _ref_rmsnorm(x, weight, eps):
    return weight * x / (jnp.sqrt(jnp.mean(jnp.square(x), axis=-1, keepdims=True)) + eps)


if __name__ == "__main__":
    key = jax.random.PRNGKey(0)
    batch, seq, emb_dim = 2, 8, 128
    x = jax.random.normal(key, (batch, seq, emb_dim), dtype=jnp.float32)

    # Deterministic parameter init, matching nn.Parameter(torch.ones(emb_dim)).
    weight = jnp.ones((emb_dim,), dtype=jnp.float32)
    eps = 1e-6

    out = jax.block_until_ready(rmsnorm(x, weight, eps))
    ref = _ref_rmsnorm(x, weight, eps)
    assert out.shape == x.shape and out.dtype == x.dtype
    assert jnp.allclose(out, ref, atol=1e-5, rtol=1e-5)

    # Ragged / non-multiple row count: exercises the masked partial trailing
    # block (no host-side pad/slice anymore).
    x2 = jax.random.normal(jax.random.PRNGKey(1), (3, 37, emb_dim), dtype=jnp.float32)
    out2 = jax.block_until_ready(rmsnorm(x2, weight, eps))
    ref2 = _ref_rmsnorm(x2, weight, eps)
    assert jnp.allclose(out2, ref2, atol=1e-5, rtol=1e-5)

    # bf16 path: f32 reduction, bf16 normalize/scale, approx reciprocal.
    x3 = jax.random.normal(jax.random.PRNGKey(2), (2, 8, emb_dim), dtype=jnp.bfloat16)
    out3 = jax.block_until_ready(rmsnorm(x3, weight, eps))
    ref3 = _ref_rmsnorm(x3.astype(jnp.float32), weight, eps)
    assert out3.dtype == jnp.bfloat16
    assert jnp.allclose(out3.astype(jnp.float32), ref3, atol=2e-2, rtol=2e-2)

    print("KERNEL_OK")
</pallas_src>

<mosaic_0001>
module attributes {stable_mosaic.version = 11 : i64} {
  func.func @_rmsnorm_kernel(%arg0: i32, %arg1: memref<16x128xf32, #tpu.memory_space<vmem>>, %arg2: memref<1x128xf32, #tpu.memory_space<vmem>>, %arg3: memref<16x128xf32, #tpu.memory_space<vmem>>) attributes {dimension_semantics = [#tpu.dimension_semantics<parallel>], iteration_bounds = array<i64: 1>, scalar_prefetch = 0 : i64, scratch_operands = 0 : i64, tpu.core_type = #tpu.core_type<tc>, window_params = [{transform_indices = @transform_0, window_bounds = array<i64: 16, 128>}, {pipeline_mode = #tpu.pipeline_mode<synchronous>, transform_indices = @transform_1, window_bounds = array<i64: 1, 128>}, {transform_indices = @transform_2, window_bounds = array<i64: 16, 128>}]} {
    %c0 = arith.constant 0 : index
    %c0_0 = arith.constant 0 : index
    %0 = vector.load %arg1[%c0, %c0_0] : memref<16x128xf32, #tpu.memory_space<vmem>>, vector<16x128xf32>
    %1 = arith.mulf %0, %0 : vector<16x128xf32>
    %cst = arith.constant dense<0.000000e+00> : vector<16xf32>
    %2 = vector.multi_reduction <add>, %1, %cst [1] : vector<16x128xf32> to vector<16xf32>
    %3 = vector.shape_cast %2 : vector<16xf32> to vector<16x1xf32>
    %cst_1 = arith.constant 1.280000e+02 : f32
    %4 = vector.broadcast %cst_1 : f32 to vector<16x1xf32>
    %5 = arith.divf %3, %4 : vector<16x1xf32>
    %6 = math.sqrt %5 : vector<16x1xf32>
    %cst_2 = arith.constant 9.99999997E-7 : f32
    %7 = vector.broadcast %cst_2 : f32 to vector<16x1xf32>
    %8 = arith.addf %6, %7 : vector<16x1xf32>
    %9 = tpu.reciprocal %8 : vector<16x1xf32> -> vector<16x1xf32>
    %10 = vector.broadcast %9 : vector<16x1xf32> to vector<16x128xf32>
    %11 = arith.mulf %0, %10 : vector<16x128xf32>
    %c0_3 = arith.constant 0 : index
    %c0_4 = arith.constant 0 : index
    %12 = vector.load %arg2[%c0_3, %c0_4] : memref<1x128xf32, #tpu.memory_space<vmem>>, vector<1x128xf32>
    %13 = vector.broadcast %12 : vector<1x128xf32> to vector<16x128xf32>
    %14 = arith.mulf %11, %13 : vector<16x128xf32>
    %c0_5 = arith.constant 0 : index
    %c0_6 = arith.constant 0 : index
    %15 = vector.load %arg3[%c0_5, %c0_6] : memref<16x128xf32, #tpu.memory_space<vmem>>, vector<16x128xf32>
    tpu.vector_store %arg3[%c0_5, %c0_6], %14 {strides = array<i32>} : memref<16x128xf32, #tpu.memory_space<vmem>>, vector<16x128xf32>,
    return
  }
  func.func @transform_0(%arg0: i32) -> (i32, i32) {
    %c0_i32 = arith.constant 0 : i32
    %c0_i32_0 = arith.constant 0 : i32
    return %arg0, %c0_i32 : i32, i32
  }
  func.func @transform_1(%arg0: i32) -> (i32, i32) {
    %c0_i32 = arith.constant 0 : i32
    %c0_i32_0 = arith.constant 0 : i32
    %c0_i32_1 = arith.constant 0 : i32
    return %c0_i32, %c0_i32_0 : i32, i32
  }
  func.func @transform_2(%arg0: i32) -> (i32, i32) {
    %c0_i32 = arith.constant 0 : i32
    %c0_i32_0 = arith.constant 0 : i32
    return %arg0, %c0_i32 : i32, i32
  }
}

</mosaic_0001>

<bundles_post_ra>
// kernel: tpu_custom_call.1
= control target key start
LH: loop header
LB: loop body
LE: loop exit
PB: predicated region body
PF: predicated region fallthrough
CT: control target
= control target key end

     0   :  { %7 = vsyncpa [#allocation3], 0  ;;  %s176_s0 = inlined_call_operand.hbm [shape: f32[16,128], index: 0, kind: input, shape index: {}]   ;;  %s177_s1 = inlined_call_operand.vmem [shape: f32[1,128], index: 1, kind: input, shape index: {}]   ;;  %s178_s2 = inlined_call_operand.hbm [shape: f32[16,128], index: 2, kind: output, shape index: {}]  }
   0x1   :  { %8 = vsyncpa [#allocation4], 0  ;;  %s142_s9 = smov [#allocation2]  }
   0x2   :  { %s14_s10 = sshll.u32 %s142_s9, 4  ;;  %s15_s10 = int_to_ptr.vmem [resolvable:$true] %s14_s10 }
   0x3   :  { %s106_s11 = scalar_lea.vmem %s15_s10, 256  ;;  %p111_p1 = scmp.lt.s32.totalorder %s15_s10, %s15_s10 }
   0x4   :  { %p107_p0 = scmp.ne.s32.totalorder %s15_s10, %s106_s11  ;;  %p112_p2 = scmp.lt.s32.totalorder %s106_s11, %s106_s11 }
   0x6   :  { %p113_p3 = por %p112_p2, %p111_p1 }
   0x8   :  { %p114_p4 = pnand %p113_p3, %p107_p0 }
   0xa   :  { %117 = shalt.err (!%p114_p4)
}
   0xb   :  { %s143_s12 = smov 128   ;;  %s144_s13 = smov 8  }
   0xc   :  { %20 = dma.hbm_to_vmem [thread:$0]  %s176_s0, 256, %s15_s10, [#allocation3], %s143_s12, %s143_s12, %s144_s13  }
   0xd   :  { %138 = dma.done.wait [#allocation3], 256  }
   0xe   :  { %139 = vsyncadd [#allocation3], 4294967040  ;;  %v26_v0 = vld [vmem:[#allocation2] sm:$0xff]  ;;  %v27_v1 = vld [vmem:[#allocation2 + $0x8] sm:$0xff]  ;;  %s145_s17 = smov [#allocation5]  }
   0xf   :  { %v28_v2 = vmul.f32 %v26_v0, %v26_v0  ;;  %v29_v3 = vmul.f32 %v27_v1, %v27_v1  ;;  %v85_v21 = vld [vmem:[%s177_s1] ss:$0 sm:$0xff]  ;;  %s73_s18 = sshll.u32 %s145_s17, 4  ;;  %s74_s18 = int_to_ptr.vmem [resolvable:$true] %s73_s18 }
  0x10   :  { %s118_s19 = scalar_lea.vmem %s74_s18, 256  ;;  %p123_p6 = scmp.lt.s32.totalorder %s74_s18, %s74_s18 }
  0x11   :  { %30 = vadd.xlane.f32.xlu0 %v28_v2  ;;  %p119_p5 = scmp.ne.s32.totalorder %s74_s18, %s118_s19  ;;  %p124_p7 = scmp.lt.s32.totalorder %s118_s19, %s118_s19 }
  0x13   :  { %p125_p8 = por %p124_p7, %p123_p6 }
  0x15   :  { %32 = vadd.xlane.f32.xlu0 %v29_v3  ;;  %p126_p9 = pnand %p125_p8, %p119_p5 }
  0x9a   :  { %v31_v4 = vpop.xlane.xlu0 %30 }
  0x9b   :  { %v35_v5 = vmul.f32 0.0078125, %v31_v4 }
  0x9d   :  { %90 = vrsqrt.f32 %v35_v5  ;;  %vm39_vm0 = vcmp.eq.f32.partialorder %v35_v5, inf  ;;  %v42_v10 = vand.u32 2147483648, %v35_v5  ;;  %vm41_vm1 = vcmp.eq.f32.partialorder %v35_v5, 0.0 }
  0x9e   :  { %v33_v6 = vpop.xlane.xlu0 %32 }
  0x9f   :  { %v36_v7 = vmul.f32 0.0078125, %v33_v6 }
  0xa1   :  { %92 = vrsqrt.f32 %v36_v7  ;;  %vm46_vm2 = vcmp.eq.f32.partialorder %v36_v7, inf  ;;  %v49_v16 = vand.u32 2147483648, %v36_v7  ;;  %vm48_vm3 = vcmp.eq.f32.partialorder %v36_v7, 0.0 }
  0xaa   :  { %v91_v8 = vpop.eup %90 }
  0xab   :  { %v38_v9 = vmul.f32 %v91_v8, %v35_v5 }
  0xad   :  { %v40_v11 = vsel %vm39_vm0, %v35_v5, %v38_v9 }
  0xae   :  { %v93_v12 = vpop.eup %92  ;;  %v43_v13 = vsel %vm41_vm1, %v42_v10, %v40_v11 }
  0xaf   :  { %v51_v14 = vadd.f32 1e-06, %v43_v13  ;;  %v45_v15 = vmul.f32 %v93_v12, %v36_v7 }
  0xb1   :  { %v47_v17 = vsel %vm46_vm2, %v36_v7, %v45_v15  ;;  %94 = vrcp.f32 %v51_v14 }
  0xb2   :  { %v50_v18 = vsel %vm48_vm3, %v49_v16, %v47_v17 }
  0xb3   :  { %v52_v19 = vadd.f32 1e-06, %v50_v18 }
  0xb5   :  { %96 = vrcp.f32 %v52_v19 }
  0xbe   :  { %v95_v20 = vpop.eup %94 }
  0xbf   :  { %v55_v22 = vmul.f32 %v95_v20, %v26_v0 }
  0xc1   :  { %v64_v23 = vmul.f32 %v85_v21, %v55_v22 }
  0xc2   :  { %v97_v24 = vpop.eup %96 }
  0xc3   :  { %v56_v25 = vmul.f32 %v97_v24, %v27_v1  ;;  %66 = vst [vmem:[#allocation5] sm:$0xff] %v64_v23 }
  0xc5   :  { %v65_v26 = vmul.f32 %v85_v21, %v56_v25 }
  0xc7   :  { %67 = vst [vmem:[#allocation5 + $0x8] sm:$0xff] %v65_v26 }
  0xc8   :  { %129 = shalt.err (!%p126_p9)
}
  0xc9   :  { %79 = dma.vmem_to_hbm [thread:$0]  %s74_s18, 256, %s178_s2, [#allocation4], %s143_s12, %s143_s12, %s144_s13  }
  0xca   :  { %140 = dma.done.wait [#allocation4], 256  }
  0xcb   :  { %141 = vsyncadd [#allocation4], 4294967040 }
  0xcc   :  { %83 = vsyncpa [#allocation3], 1 }
  0xcd   :  { %84 = vsyncpa [#allocation4], 1 }

</bundles_post_ra>
